<compile_context>
chip_gen: v6e
topology: v6e:2x2x1
jax: 0.10.0
libtpu: 0.0.40
codegen_flags: <defaults>
</compile_context>

<pallas_src>
import jax
import jax.numpy as jnp
import numpy as np
from jax.experimental import pallas as pl
from jax.experimental.pallas import tpu as pltpu


def _feature_comb_kernel(x_ref,     # VMEM (bm*S, D)   -- bm batch rows x S frames, flattened
                         wbb_ref,   # VMEM (D, F)      -- synthetic backbone Linear weight
                         bbb_ref,   # VMEM (1, F)      -- synthetic backbone Linear bias
                         sel_ref,   # VMEM (bm, bm*S)  -- Conv1d combine as block-diag weights
                         wfc_ref,   # VMEM (F, 1)      -- fc weight, row 0 only (transposed)
                         bfc_ref,   # VMEM (1, 1)      -- fc bias, element 0 only
                         out_ref):  # VMEM (bm, 1)
    # Per-frame backbone features for every (batch, frame) row at once.
    # (Dropout is identity at inference.)
    feats = jnp.dot(x_ref[...], wbb_ref[...],
                    preferred_element_type=jnp.float32)          # (bm*S, F)
    feats = feats + bbb_ref[...]

    # combine == 'conv': weighted sum over the stack axis, as one MXU matmul
    # with the block-diagonal comb_w selection matrix.
    combined = jnp.dot(sel_ref[...], feats,
                       preferred_element_type=jnp.float32)       # (bm, F)

    # fc(combined)[:, 0] -> only the used logit column.
    logits = jnp.dot(combined, wfc_ref[...],
                     preferred_element_type=jnp.float32)         # (bm, 1)
    out_ref[...] = (logits + bfc_ref[...]).astype(out_ref.dtype)


def feature_comb_forward(x, w_bb, b_bb, comb_w, w_fc, b_fc):
    """x: (B, S, C, H, W) f32. Returns (B,) = fc(combine(backbone(x[:, s])))[:, 0]."""
    B, S, C, H, W = x.shape
    D = C * H * W
    F = w_bb.shape[1]

    # Free reshapes (contiguous) -- no transpose / HBM relayout.
    x2 = x.reshape(B * S, D)                                    # row b*S + s == frame x[b, s]
    bbb = b_bb.reshape(1, F)
    wfc0 = w_fc[0].reshape(F, 1)                                # only logit 0 is used
    bfc0 = b_fc[0].reshape(1, 1)

    # Conv1d(num_stack, 1, k=1, bias=False) combine as a block-diagonal matrix:
    # sel[b, b*S + s] = comb_w[s]. Tiny (B x B*S) parameter prep in the wrapper.
    sel = jnp.kron(jnp.eye(B, dtype=jnp.float32), comb_w.reshape(1, S))

    # Batch tiling: full batch per step at small B; 128-row tiles (parallel
    # across TensorCores on v7x) for large B.
    bm = B if B <= 128 else 128
    nb = pl.cdiv(B, bm)

    out = pl.pallas_call(
        _feature_comb_kernel,
        out_shape=jax.ShapeDtypeStruct((B, 1), jnp.float32),
        grid=(nb,),
        in_specs=[
            pl.BlockSpec((bm * S, D), lambda i: (i, 0)),        # frames for batch tile i
            pl.BlockSpec((D, F), lambda i: (0, 0)),             # backbone W (resident)
            pl.BlockSpec((1, F), lambda i: (0, 0)),             # backbone b
            pl.BlockSpec((bm, bm * S), lambda i: (i, i)),       # diagonal block of sel
            pl.BlockSpec((F, 1), lambda i: (0, 0)),             # fc W row 0 (as column)
            pl.BlockSpec((1, 1), lambda i: (0, 0)),             # fc b[0]
        ],
        out_specs=pl.BlockSpec((bm, 1), lambda i: (i, 0)),
        compiler_params=pltpu.CompilerParams(
            dimension_semantics=("parallel",)),
    )(x2, w_bb, bbb, sel, wfc0, bfc0)

    return out.reshape(B)


def _reference(x, w_bb, b_bb, comb_w, w_fc, b_fc):
    B, S, C, H, W = x.shape
    D = C * H * W
    xf = x.reshape(B, S, D)
    feats = jnp.einsum('bsd,df->bsf', xf, w_bb,
                       precision=jax.lax.Precision.HIGHEST) + b_bb.reshape(1, 1, -1)
    combined = jnp.einsum('s,bsf->bf', comb_w, feats,
                          precision=jax.lax.Precision.HIGHEST)
    logits = jnp.einsum('bf,cf->bc', combined, w_fc,
                        precision=jax.lax.Precision.HIGHEST) + b_fc.reshape(1, -1)
    return logits[:, 0]


if __name__ == "__main__":
    # Small shapes consistent with the module's forward.
    B, S, C, H, W = 2, 5, 4, 8, 8        # batch, num_stack, NCHW frame
    D = C * H * W                        # flattened frame dim = 256
    F = 32                               # dim_feats
    NC = 2                               # num_classes

    key = jax.random.PRNGKey(0)
    kx, k1, k2, k3, k4, k5 = jax.random.split(key, 6)

    x = jax.random.normal(kx, (B, S, C, H, W), dtype=jnp.float32)
    w_bb = jax.random.normal(k1, (D, F), dtype=jnp.float32) * 0.05
    b_bb = jax.random.normal(k2, (F,), dtype=jnp.float32) * 0.1
    comb_w = jax.random.normal(k3, (S,), dtype=jnp.float32) * 0.3   # Conv1d(S,1,1) weight
    w_fc = jax.random.normal(k4, (NC, F), dtype=jnp.float32) * 0.1  # Linear(F, NC) weight
    b_fc = jax.random.normal(k5, (NC,), dtype=jnp.float32) * 0.1

    out = feature_comb_forward(x, w_bb, b_bb, comb_w, w_fc, b_fc)
    out = jax.block_until_ready(out)

    ref = _reference(x, w_bb, b_bb, comb_w, w_fc, b_fc)
    np.testing.assert_allclose(np.asarray(out), np.asarray(ref), rtol=2e-3, atol=2e-3)

    print("KERNEL_OK")
</pallas_src>

<mosaic_0001>
module attributes {stable_mosaic.version = 11 : i64} {
  func.func @_feature_comb_kernel(%arg0: i32, %arg1: memref<10x256xf32, #tpu.memory_space<vmem>>, %arg2: memref<256x32xf32, #tpu.memory_space<vmem>>, %arg3: memref<1x32xf32, #tpu.memory_space<vmem>>, %arg4: memref<2x10xf32, #tpu.memory_space<vmem>>, %arg5: memref<32x1xf32, #tpu.memory_space<vmem>>, %arg6: memref<1x1xf32, #tpu.memory_space<vmem>>, %arg7: memref<2x1xf32, #tpu.memory_space<vmem>>) attributes {dimension_semantics = [#tpu.dimension_semantics<parallel>], iteration_bounds = array<i64: 1>, scalar_prefetch = 0 : i64, scratch_operands = 0 : i64, tpu.core_type = #tpu.core_type<tc>, window_params = [{transform_indices = @transform_0, window_bounds = array<i64: 10, 256>}, {pipeline_mode = #tpu.pipeline_mode<synchronous>, transform_indices = @transform_1, window_bounds = array<i64: 256, 32>}, {pipeline_mode = #tpu.pipeline_mode<synchronous>, transform_indices = @transform_2, window_bounds = array<i64: 1, 32>}, {transform_indices = @transform_3, window_bounds = array<i64: 2, 10>}, {pipeline_mode = #tpu.pipeline_mode<synchronous>, transform_indices = @transform_4, window_bounds = array<i64: 32, 1>}, {pipeline_mode = #tpu.pipeline_mode<synchronous>, transform_indices = @transform_5, window_bounds = array<i64: 1, 1>}, {transform_indices = @transform_6, window_bounds = array<i64: 2, 1>}]} {
    %c0 = arith.constant 0 : index
    %c0_0 = arith.constant 0 : index
    %0 = vector.load %arg1[%c0, %c0_0] : memref<10x256xf32, #tpu.memory_space<vmem>>, vector<10x256xf32>
    %c0_1 = arith.constant 0 : index
    %c0_2 = arith.constant 0 : index
    %1 = vector.load %arg2[%c0_1, %c0_2] : memref<256x32xf32, #tpu.memory_space<vmem>>, vector<256x32xf32>
    %cst = arith.constant dense<0.000000e+00> : vector<10x32xf32>
    %2 = tpu.matmul %0, %1, %cst {dimension_numbers = #tpu.dot_dimension_numbers<[1], [0], [0], [1], [0, 0, 1, 1], [], []>} : vector<10x256xf32>, vector<256x32xf32>, vector<10x32xf32> -> vector<10x32xf32>
    %c0_3 = arith.constant 0 : index
    %c0_4 = arith.constant 0 : index
    %3 = vector.load %arg3[%c0_3, %c0_4] : memref<1x32xf32, #tpu.memory_space<vmem>>, vector<1x32xf32>
    %4 = vector.broadcast %3 : vector<1x32xf32> to vector<10x32xf32>
    %5 = arith.addf %2, %4 : vector<10x32xf32>
    %c0_5 = arith.constant 0 : index
    %c0_6 = arith.constant 0 : index
    %6 = vector.load %arg4[%c0_5, %c0_6] : memref<2x10xf32, #tpu.memory_space<vmem>>, vector<2x10xf32>
    %cst_7 = arith.constant dense<0.000000e+00> : vector<2x32xf32>
    %7 = tpu.matmul %6, %5, %cst_7 {dimension_numbers = #tpu.dot_dimension_numbers<[1], [0], [0], [1], [0, 0, 1, 1], [], []>} : vector<2x10xf32>, vector<10x32xf32>, vector<2x32xf32> -> vector<2x32xf32>
    %c0_8 = arith.constant 0 : index
    %c0_9 = arith.constant 0 : index
    %8 = vector.load %arg5[%c0_8, %c0_9] : memref<32x1xf32, #tpu.memory_space<vmem>>, vector<32x1xf32>
    %cst_10 = arith.constant dense<0.000000e+00> : vector<2x1xf32>
    %9 = tpu.matmul %7, %8, %cst_10 {dimension_numbers = #tpu.dot_dimension_numbers<[1], [0], [0], [1], [0, 0, 1, 1], [], []>} : vector<2x32xf32>, vector<32x1xf32>, vector<2x1xf32> -> vector<2x1xf32>
    %c0_11 = arith.constant 0 : index
    %c0_12 = arith.constant 0 : index
    %10 = vector.load %arg6[%c0_11, %c0_12] : memref<1x1xf32, #tpu.memory_space<vmem>>, vector<1x1xf32>
    %11 = vector.broadcast %10 : vector<1x1xf32> to vector<2x1xf32>
    %12 = arith.addf %9, %11 : vector<2x1xf32>
    %c0_13 = arith.constant 0 : index
    %c0_14 = arith.constant 0 : index
    %13 = vector.load %arg7[%c0_13, %c0_14] : memref<2x1xf32, #tpu.memory_space<vmem>>, vector<2x1xf32>
    tpu.vector_store %arg7[%c0_13, %c0_14], %12 {strides = array<i32>} : memref<2x1xf32, #tpu.memory_space<vmem>>, vector<2x1xf32>,
    return
  }
  func.func @transform_0(%arg0: i32) -> (i32, i32) {
    %c0_i32 = arith.constant 0 : i32
    %c0_i32_0 = arith.constant 0 : i32
    return %arg0, %c0_i32 : i32, i32
  }
  func.func @transform_1(%arg0: i32) -> (i32, i32) {
    %c0_i32 = arith.constant 0 : i32
    %c0_i32_0 = arith.constant 0 : i32
    %c0_i32_1 = arith.constant 0 : i32
    return %c0_i32, %c0_i32_0 : i32, i32
  }
  func.func @transform_2(%arg0: i32) -> (i32, i32) {
    %c0_i32 = arith.constant 0 : i32
    %c0_i32_0 = arith.constant 0 : i32
    %c0_i32_1 = arith.constant 0 : i32
    return %c0_i32, %c0_i32_0 : i32, i32
  }
  func.func @transform_3(%arg0: i32) -> (i32, i32) {
    %c0_i32 = arith.constant 0 : i32
    return %arg0, %arg0 : i32, i32
  }
  func.func @transform_4(%arg0: i32) -> (i32, i32) {
    %c0_i32 = arith.constant 0 : i32
    %c0_i32_0 = arith.constant 0 : i32
    %c0_i32_1 = arith.constant 0 : i32
    return %c0_i32, %c0_i32_0 : i32, i32
  }
  func.func @transform_5(%arg0: i32) -> (i32, i32) {
    %c0_i32 = arith.constant 0 : i32
    %c0_i32_0 = arith.constant 0 : i32
    %c0_i32_1 = arith.constant 0 : i32
    return %c0_i32, %c0_i32_0 : i32, i32
  }
  func.func @transform_6(%arg0: i32) -> (i32, i32) {
    %c0_i32 = arith.constant 0 : i32
    %c0_i32_0 = arith.constant 0 : i32
    return %arg0, %c0_i32 : i32, i32
  }
}

</mosaic_0001>

<bundles_post_ra>
// kernel: tpu_custom_call.1
= control target key start
LH: loop header
LB: loop body
LE: loop exit
PB: predicated region body
PF: predicated region fallthrough
CT: control target
= control target key end

     0   :  { %v384_v36 = vmov 0.0   ;;  %vm385_vm0 = vmmov 0   ;;  %vm148_vm1 = vcmask 1041408   ;;  %vm144_vm2 = vcmask 80896   ;;  %s555_s1 = inlined_call_operand.vmem [shape: f32[256,32], index: 1, kind: input, shape index: {}]   ;;  %s556_s0 = inlined_call_operand.vmem [shape: f32[10,256], index: 0, kind: input, shape index: {}]   ;;  %s557_s2 = inlined_call_operand.vmem [shape: f32[1,32], index: 2, kind: input, shape index: {}]   ;;  %s558_s3 = inlined_call_operand.vmem [shape: f32[2,10], index: 3, kind: input, shape index: {}]   ;;  %s559_s4 = inlined_call_operand.vmem [shape: f32[32,1], index: 4, kind: input, shape index: {}]   ;;  %s560_s5 = inlined_call_operand.<no memory space> [shape: f32[1,1], index: 5, kind: input, shape index: {}]   ;;  %s561_s6 = inlined_call_operand.vmem [shape: f32[2,1], index: 6, kind: output, shape index: {}]  }
   0x1   :  { %v60_v0 = vld [vmem:[%s555_s1 + $0xf8] sm:$0xff]  ;;  %v59_v2 = vld [vmem:[%s555_s1 + $0xf0] sm:$0xff]  ;;  %v58_v4 = vld [vmem:[%s555_s1 + $0xe8] sm:$0xff]  ;;  %364 = vmatprep.subr.mxu1 %v384_v36  ;;  %368 = vmatprep.mubr.msk.f32.mxu1 %vm385_vm0, %v384_v36  ;;  %v11_v51 = vstv %s560_s5  ;;  %vm233_vm3 = vcmask 261120   ;;  %vm307_vm4 = vcmask 1024  }
   0x2   :  { %v44_v1 = vld [vmem:[%s555_s1 + $0x78] sm:$0xff]  ;;  %318 = vmatprep.subr.mxu0 %v60_v0  ;;  %v43_v3 = vld [vmem:[%s555_s1 + $0x70] sm:$0xff]  ;;  %v42_v5 = vld [vmem:[%s555_s1 + $0x68] sm:$0xff]  ;;  %12 = vst [vmem:[#allocation2] sm:$0x1] %v11_v51 }
   0x3   :  { %319 = vmatpush3.msra.mxu0 %v44_v1  ;;  %v57_v6 = vld [vmem:[%s555_s1 + $0xe0] sm:$0xff]  ;;  %v56_v8 = vld [vmem:[%s555_s1 + $0xd8] sm:$0xff]  ;;  %v55_v10 = vld [vmem:[%s555_s1 + $0xd0] sm:$0xff] }
   0x4   :  { %320 = vmatprep.subr.mxu0 %v59_v2  ;;  %v41_v7 = vld [vmem:[%s555_s1 + $0x60] sm:$0xff]  ;;  %v40_v9 = vld [vmem:[%s555_s1 + $0x58] sm:$0xff]  ;;  %v39_v11 = vld [vmem:[%s555_s1 + $0x50] sm:$0xff] }
   0x5   :  { %321 = vmatpush3.msra.mxu0 %v43_v3  ;;  %v54_v12 = vld [vmem:[%s555_s1 + $0xc8] sm:$0xff]  ;;  %v53_v15 = vld [vmem:[%s555_s1 + $0xc0] sm:$0xff]  ;;  %v52_v17 = vld [vmem:[%s555_s1 + $0xb8] sm:$0xff] }
   0x6   :  { %322 = vmatprep.subr.mxu0 %v58_v4  ;;  %v26_v13 = vld [vmem:[%s556_s0 + $0x8] sm:$0xff]  ;;  %v37_v16 = vld [vmem:[%s555_s1 + $0x40] sm:$0xff]  ;;  %v36_v18 = vld [vmem:[%s555_s1 + $0x38] sm:$0xff] }
   0x7   :  { %323 = vmatpush3.msra.mxu0 %v42_v5  ;;  %v38_v14 = vld [vmem:[%s555_s1 + $0x48] sm:$0xff]  ;;  %132 = vmatprep.mubr.f32.mxu0 %v26_v13  ;;  %v51_v19 = vld [vmem:[%s555_s1 + $0xb0] sm:$0xff]  ;;  %v49_v23 = vld [vmem:[%s555_s1 + $0xa0] sm:$0xff] }
   0x8   :  { %324 = vmatprep.subr.mxu0 %v57_v6  ;;  %v35_v20 = vld [vmem:[%s555_s1 + $0x30] sm:$0xff]  ;;  %v50_v21 = vld [vmem:[%s555_s1 + $0xa8] sm:$0xff]  ;;  %v33_v24 = vld [vmem:[%s555_s1 + $0x20] sm:$0xff] }
   0x9   :  { %325 = vmatpush3.msra.mxu0 %v41_v7  ;;  %v34_v22 = vld [vmem:[%s555_s1 + $0x28] sm:$0xff]  ;;  %v48_v25 = vld [vmem:[%s555_s1 + $0x98] sm:$0xff]  ;;  %v47_v27 = vld [vmem:[%s555_s1 + $0x90] sm:$0xff] }
   0xa   :  { %326 = vmatprep.subr.mxu0 %v56_v8  ;;  %v32_v26 = vld [vmem:[%s555_s1 + $0x18] sm:$0xff]  ;;  %v31_v28 = vld [vmem:[%s555_s1 + $0x10] sm:$0xff]  ;;  %v46_v29 = vld [vmem:[%s555_s1 + $0x88] sm:$0xff] }
   0xb   :  { %327 = vmatpush3.msra.mxu0 %v40_v9  ;;  %v30_v30 = vld [vmem:[%s555_s1 + $0x8] sm:$0xff]  ;;  %v45_v31 = vld [vmem:[%s555_s1 + $0x80] sm:$0xff]  ;;  %v28_v34 = vld [vmem:[%s556_s0 + $0x18] sm:$0x3] }
   0xc   :  { %328 = vmatprep.subr.mxu0 %v55_v10  ;;  %v29_v32 = vld [vmem:[%s555_s1] sm:$0xff]  ;;  %v27_v35 = vld [vmem:[%s556_s0 + $0x10] sm:$0x3]  ;;  %v225_v47 = vld [vmem:[%s559_s4 + $0x18] sm:$0xff] }
   0xd   :  { %329 = vmatpush3.msra.mxu0 %v39_v11  ;;  %v25_v33 = vld [vmem:[%s556_s0] sm:$0xff]  ;;  %v224_v48 = vld [vmem:[%s559_s4 + $0x10] sm:$0xff]  ;;  %v223_v49 = vld [vmem:[%s559_s4 + $0x8] sm:$0xff] }
   0xe   :  { %330 = vmatprep.subr.mxu0 %v54_v12  ;;  %v313_v43 = vld [vmem:[%s557_s2] ss:$0 sm:$0xff] }
   0xf   :  { %331 = vmatpush3.msra.mxu0 %v38_v14  ;;  %v143_v46 = vld [vmem:[%s558_s3] sm:$0x3] }
  0x10   :  { %332 = vmatprep.subr.mxu0 %v53_v15  ;;  %v222_v50 = vld [vmem:[%s559_s4] sm:$0xff] }
  0x11   :  { %333 = vmatpush3.msra.mxu0 %v37_v16  ;;  %v316_v54 = vld [vmem:[#allocation2] ss:$0 sm:$0xff] }
  0x12   :  { %334 = vmatprep.subr.mxu0 %v52_v17 }
  0x13   :  { %335 = vmatpush3.msra.mxu0 %v36_v18 }
  0x14   :  { %336 = vmatprep.subr.mxu0 %v51_v19 }
  0x15   :  { %337 = vmatpush3.msra.mxu0 %v35_v20 }
  0x16   :  { %338 = vmatprep.subr.mxu0 %v50_v21 }
  0x17   :  { %339 = vmatpush3.msra.mxu0 %v34_v22 }
  0x18   :  { %340 = vmatprep.subr.mxu0 %v49_v23 }
  0x19   :  { %341 = vmatpush3.msra.mxu0 %v33_v24 }
  0x1a   :  { %342 = vmatprep.subr.mxu0 %v48_v25 }
  0x1b   :  { %343 = vmatpush3.msra.mxu0 %v32_v26 }
  0x1c   :  { %344 = vmatprep.subr.mxu0 %v47_v27 }
  0x1d   :  { %345 = vmatpush3.msra.mxu0 %v31_v28 }
  0x1e   :  { %346 = vmatprep.subr.mxu0 %v46_v29 }
  0x1f   :  { %347 = vmatpush3.msra.mxu0 %v30_v30 }
  0x20   :  { %348 = vmatprep.subr.mxu0 %v45_v31 }
  0x21   :  { %349 = vmatpush3.msra.mxu0 %v29_v32 }
  0x22   :  { %133 = vmatmul.mubr.f32.vlgmr.msra.gmra.mxu0 %v25_v33 }
  0x23   :  { %137 = vmatprep.mubr.f32.mxu0 %v28_v34 }
  0x26   :  { %138 = vmatmul.mubr.f32.gmra.mxu0 %v27_v35 }
  0xe2   :  { %v350_v37 = vpop.f32.mrf.mxu0 }
  0xe4   :  { %v351_v38 = vpop.f32.mrf.mxu0 }
  0xe5   :  { %v352_v41 = vadd.f32 %v351_v38, %v350_v37 }
  0xe6   :  { %v353_v39 = vpop.f32.mrf.mxu0 }
  0xe7   :  { %v135_v45 = vadd.f32 %v352_v41, %v313_v43 }
  0xe8   :  { %v354_v40 = vpop.f32.mrf.mxu0 }
  0xe9   :  { %v355_v42 = vadd.f32 %v354_v40, %v353_v39 }
  0xeb   :  { %v140_v44 = vadd.f32 %v355_v42, %v313_v43 }
  0xed   :  { %365 = vmatpush3.msk.msra.mxu1 %vm148_vm1, %v140_v44 }
  0xee   :  { %366 = vmatprep.subr.mxu1 %v384_v36 }
  0xef   :  { %367 = vmatpush3.msra.mxu1 %v135_v45 }
  0xf0   :  { %369 = vmatmul.mubr.msk.f32.vlgmr.msra.gmra.mxu1 %vm144_vm2, %v143_v46  ;;  %371 = vmatprep.subr.mxu1 %v384_v36 }
  0xf1   :  { %372 = vmatpush3.msra.mxu1 %v225_v47  ;;  %379 = vmatprep.mubr.msk.f32.mxu1 %vm385_vm0, %v384_v36 }
  0xf2   :  { %373 = vmatprep.subr.mxu1 %v384_v36 }
  0xf3   :  { %374 = vmatpush3.msra.mxu1 %v224_v48 }
  0xf4   :  { %375 = vmatprep.subr.mxu1 %v384_v36 }
  0xf5   :  { %376 = vmatpush3.msra.mxu1 %v223_v49 }
  0xf6   :  { %377 = vmatprep.subr.mxu1 %v384_v36 }
  0xf7   :  { %378 = vmatpush3.msra.mxu1 %v222_v50 }
 0x1b0   :  { %v218_v52 = vpop.f32.mrf.mxu1 }
 0x1b1   :  { %380 = vmatmul.mubr.msk.f32.vlgmr.msra.gmra.mxu1 %vm233_vm3, %v218_v52 }
 0x1b2   :  { %v370_v53 = vpop.f32.mrf.mxu1 }
 0x271   :  { %v303_v55 = vpop.f32.mrf.mxu1 }
 0x272   :  { %v304_v56 = vadd.f32 %v316_v54, %v303_v55 }
 0x273   :  { %v381_v57 = vpop.f32.mrf.mxu1 }
 0x274   :  { %308 = vst.msk [vmem:[%s561_s6] sm:$0x3] %vm307_vm4, %v304_v56 }

</bundles_post_ra>
